<compile_context>
chip_gen: v5e
topology: v5e:2x2
jax: 0.10.0
libtpu: 0.0.40
codegen_flags: <defaults>
</compile_context>

<pallas_src>
import functools

import jax
import jax.numpy as jnp
from jax import lax
from jax.experimental import pallas as pl
from jax.experimental.pallas import tpu as pltpu


def _ceil_div(a, b):
    return -(-a // b)


def _tpu_generation():
    """Best-effort TPU generation sniff (5 / 6 / 7); default 6."""
    try:
        kind = jax.devices()[0].device_kind.lower()
    except Exception:
        return 6
    if "v5" in kind:
        return 5
    if "v4" in kind or "v3" in kind or "v2" in kind:
        return 5          # treat older chips like the 8-grain / 1-TC case
    if "7" in kind:
        return 7
    return 6


def mfm_conv_kernel(x_ref, w_ref, b_ref, o_ref, *, H, Wp, cout, bblk):
    # x_ref: (bblk, Cin_pad, (H+3)*Wp) bf16  row-flattened, zero-padded input
    # w_ref: (2*cout, 9*Cin_pad)       bf16  weight, K ordered as (kh, kw, cin)
    # b_ref: (2*cout, 1)               f32   bias (broadcast along lanes)
    # o_ref: (bblk, cout, H*Wp)        bf16  flattened output rows (row stride Wp)
    lout = H * Wp

    x = x_ref[...]                                   # (bblk, Cin_pad, Lin) bf16

    # im2col slab: tap (kh, kw) is a contiguous lane slice of the flat image.
    # Batch elements are concatenated along lanes at multiples of Lout (% 128 == 0).
    taps = []
    for kh in range(3):                              # static 3x3 unroll
        for kw in range(3):
            s = kh * Wp + kw
            cols = [x[b, :, s:s + lout] for b in range(bblk)]
            taps.append(cols[0] if bblk == 1 else jnp.concatenate(cols, axis=1))
    slab = jnp.concatenate(taps, axis=0)             # (9*Cin_pad, bblk*Lout) bf16

    # Single MXU matmul: bf16 x bf16 -> f32 accumulation.
    acc = jnp.dot(w_ref[...], slab,
                  preferred_element_type=jnp.float32)   # (2*cout, bblk*Lout) f32
    acc = acc + b_ref[...]                              # + (2*cout, 1) bias

    # Max-Feature-Map: split output channels in half, elementwise max (f32),
    # then cast once at the store (bf16 writeback).
    out = jnp.maximum(acc[:cout], acc[cout:]).astype(o_ref.dtype)
    for b in range(bblk):
        o_ref[b] = out[:, b * lout:(b + 1) * lout]


@functools.partial(jax.jit, static_argnames=("out_channels",))
def mfm_forward(x_nchw, weight_oihw, bias, out_channels):
    """x_nchw: (N, Cin, H, W); weight_oihw: (2*out, Cin, 3, 3); bias: (2*out,)."""
    N, Cin, H, W = x_nchw.shape
    gen = _tpu_generation()

    # --- channel padding -----------------------------------------------------
    grain = 8 if gen <= 5 else 16          # bf16 sublane grain per generation
    cout = out_channels
    cout_pad = _ceil_div(cout, 8) * 8      # keep the f32 split/max sublane-aligned
    C2p = 2 * cout_pad
    Cin_pad = _ceil_div(Cin, grain) * grain

    # --- padded row width: lane-dense Lout -----------------------------------
    Wp = W + 2                             # conv halo
    while (H * Wp) % 128 != 0 and Wp < W + 2 + 128:
        Wp += 1
    if (H * Wp) % 128 != 0:
        Wp = W + 2                         # fallback; correctness never depends on it
    Lin = (H + 3) * Wp                     # +1 top row, +2 bottom rows (tap overrun)
    Lout = H * Wp

    # --- batch blocking: few, fat grid steps ----------------------------------
    # Per-batch-element VMEM working set (double-buffered in/out blocks + slab + acc).
    per_b = (2 * Cin_pad * Lin * 2            # input block (x2 buffers), bf16
             + 9 * Cin_pad * Lout * 2         # im2col slab, bf16
             + C2p * Lout * 4                 # f32 accumulator / epilogue
             + 2 * cout_pad * Lout * 2)       # output block (x2 buffers), bf16
    budget = 12 * 1024 * 1024                 # safely under default scoped VMEM on all gens
    bblk_cap = max(1, budget // per_b)
    num_steps = max(1, _ceil_div(N, bblk_cap))
    if gen >= 7:                              # 2 TensorCores: keep an even step count >= 2
        num_steps = max(2, num_steps + (num_steps % 2))
    bblk = _ceil_div(N, num_steps)
    Npad = num_steps * bblk

    # --- input prep: one fused bf16-cast + zero-pad pass, then a free reshape --
    xp = jnp.pad(x_nchw.astype(jnp.bfloat16),
                 ((0, Npad - N), (0, Cin_pad - Cin), (1, 2), (1, Wp - W - 1)))
    xf = xp.reshape(Npad, Cin_pad, Lin)

    # --- weight / bias prep (tiny tensors) ------------------------------------
    # Pad each half of the output channels separately so the kernel's
    # acc[:cout_pad] / acc[cout_pad:] split still pairs the right channels.
    w = weight_oihw.astype(jnp.float32)
    w1 = jnp.pad(w[:cout], ((0, cout_pad - cout), (0, Cin_pad - Cin), (0, 0), (0, 0)))
    w2 = jnp.pad(w[cout:], ((0, cout_pad - cout), (0, Cin_pad - Cin), (0, 0), (0, 0)))
    w_full = jnp.concatenate([w1, w2], axis=0)                  # (C2p, Cin_pad, 3, 3)
    w_mat = jnp.transpose(w_full, (0, 2, 3, 1)).reshape(C2p, 9 * Cin_pad)
    w_mat = w_mat.astype(jnp.bfloat16)                          # K ordered (kh, kw, cin)

    b = bias.astype(jnp.float32)
    b1 = jnp.pad(b[:cout], (0, cout_pad - cout))
    b2 = jnp.pad(b[cout:], (0, cout_pad - cout))
    b_col = jnp.concatenate([b1, b2]).reshape(C2p, 1)

    kernel = functools.partial(mfm_conv_kernel, H=H, Wp=Wp, cout=cout_pad, bblk=bblk)

    cost = pl.CostEstimate(
        flops=2 * Npad * Lout * (9 * Cin_pad) * C2p,            # padded work actually done
        transcendentals=0,
        bytes_accessed=(Npad * Cin_pad * Lin * 2                # bf16 input
                        + C2p * 9 * Cin_pad * 2 + C2p * 4       # weights + bias
                        + Npad * cout_pad * Lout * 2))          # bf16 output

    out_flat = pl.pallas_call(
        kernel,
        out_shape=jax.ShapeDtypeStruct((Npad, cout_pad, Lout), jnp.bfloat16),
        grid=(num_steps,),
        in_specs=[
            pl.BlockSpec((bblk, Cin_pad, Lin), lambda n: (n, 0, 0)),
            pl.BlockSpec((C2p, 9 * Cin_pad), lambda n: (0, 0)),
            pl.BlockSpec((C2p, 1), lambda n: (0, 0)),
        ],
        out_specs=pl.BlockSpec((bblk, cout_pad, Lout), lambda n: (n, 0, 0)),
        compiler_params=pltpu.CompilerParams(dimension_semantics=("parallel",)),
        cost_estimate=cost,
    )(xf, w_mat, b_col)

    # Back to NCHW: drop padded batch / channels / columns (fused with the cast).
    out = out_flat.reshape(Npad, cout_pad, H, Wp)[:N, :cout, :, :W]
    return out.astype(x_nchw.dtype)


def reference_mfm(x_nchw, weight_oihw, bias, out_channels):
    y = lax.conv_general_dilated(
        x_nchw, weight_oihw, window_strides=(1, 1), padding=((1, 1), (1, 1)),
        dimension_numbers=("NCHW", "OIHW", "NCHW"),
        preferred_element_type=jnp.float32,
        precision=lax.Precision.HIGHEST)
    y = y + bias.astype(jnp.float32)[None, :, None, None]
    return jnp.maximum(y[:, :out_channels], y[:, out_channels:])


if __name__ == "__main__":
    # Small shapes consistent with the module's forward (type=1, conv path).
    N, Cin, H, W = 2, 4, 16, 16
    out_channels = 8
    ksize = 3

    key = jax.random.PRNGKey(0)
    kx, kw = jax.random.split(key)

    x = jax.random.normal(kx, (N, Cin, H, W), dtype=jnp.float32)

    # Deterministic init mirroring the module: xavier_uniform_ weight, bias=0.1
    fan_in = Cin * ksize * ksize
    fan_out = (2 * out_channels) * ksize * ksize
    bound = (6.0 / (fan_in + fan_out)) ** 0.5
    weight = jax.random.uniform(
        kw, (2 * out_channels, Cin, ksize, ksize),
        minval=-bound, maxval=bound, dtype=jnp.float32)
    bias = jnp.full((2 * out_channels,), 0.1, dtype=jnp.float32)

    out = mfm_forward(x, weight, bias, out_channels)
    out = jax.block_until_ready(out)
    assert out.shape == (N, out_channels, H, W), out.shape

    # Tight check: same bf16 quantization of inputs/weights and a bf16-rounded
    # output, f32 math in between (matches the kernel's numerics).
    ref_q = jax.block_until_ready(reference_mfm(
        x.astype(jnp.bfloat16).astype(jnp.float32),
        weight.astype(jnp.bfloat16).astype(jnp.float32), bias, out_channels))
    ref_q_b = ref_q.astype(jnp.bfloat16).astype(jnp.float32)
    err_q = float(jnp.max(jnp.abs(out - ref_q_b)))
    assert jnp.allclose(out, ref_q_b, atol=1e-3, rtol=1e-2), err_q

    # Sanity check vs full-f32 reference (loose tolerance for bf16 in/out).
    ref_f32 = jax.block_until_ready(reference_mfm(x, weight, bias, out_channels))
    err_f32 = float(jnp.max(jnp.abs(out - ref_f32)))
    assert jnp.allclose(out, ref_f32, atol=5e-2, rtol=5e-2), err_f32

    print("KERNEL_OK")
</pallas_src>

<mosaic_0001>
module attributes {stable_mosaic.version = 11 : i64} {
  func.func @mfm_conv_kernel(%arg0: i32, %arg1: memref<2x16x456xbf16, #tpu.memory_space<vmem>>, %arg2: memref<16x144xbf16, #tpu.memory_space<vmem>>, %arg3: memref<16x1xf32, #tpu.memory_space<vmem>>, %arg4: memref<2x8x384xbf16, #tpu.memory_space<vmem>>) attributes {dimension_semantics = [#tpu.dimension_semantics<parallel>], iteration_bounds = array<i64: 1>, scalar_prefetch = 0 : i64, scratch_operands = 0 : i64, tpu.core_type = #tpu.core_type<tc>, window_params = [{transform_indices = @transform_0, window_bounds = array<i64: 2, 16, 456>}, {pipeline_mode = #tpu.pipeline_mode<synchronous>, transform_indices = @transform_1, window_bounds = array<i64: 16, 144>}, {pipeline_mode = #tpu.pipeline_mode<synchronous>, transform_indices = @transform_2, window_bounds = array<i64: 16, 1>}, {transform_indices = @transform_3, window_bounds = array<i64: 2, 8, 384>}]} {
    %c0 = arith.constant 0 : index
    %c0_0 = arith.constant 0 : index
    %c0_1 = arith.constant 0 : index
    %0 = vector.load %arg1[%c0, %c0_0, %c0_1] : memref<2x16x456xbf16, #tpu.memory_space<vmem>>, vector<2x16x456xbf16>
    %1 = vector.extract_strided_slice %0 {offsets = [0, 0, 0], sizes = [1, 16, 384], strides = [1, 1, 1]} : vector<2x16x456xbf16> to vector<1x16x384xbf16>
    %2 = vector.shape_cast %1 : vector<1x16x384xbf16> to vector<16x384xbf16>
    %3 = vector.extract_strided_slice %0 {offsets = [1, 0, 0], sizes = [1, 16, 384], strides = [1, 1, 1]} : vector<2x16x456xbf16> to vector<1x16x384xbf16>
    %4 = vector.shape_cast %3 : vector<1x16x384xbf16> to vector<16x384xbf16>
    %5 = tpu.concatenate %2, %4 in 1 : vector<16x384xbf16>, vector<16x384xbf16> -> vector<16x768xbf16>
    %6 = vector.extract_strided_slice %0 {offsets = [0, 0, 1], sizes = [1, 16, 384], strides = [1, 1, 1]} : vector<2x16x456xbf16> to vector<1x16x384xbf16>
    %7 = vector.shape_cast %6 : vector<1x16x384xbf16> to vector<16x384xbf16>
    %8 = vector.extract_strided_slice %0 {offsets = [1, 0, 1], sizes = [1, 16, 384], strides = [1, 1, 1]} : vector<2x16x456xbf16> to vector<1x16x384xbf16>
    %9 = vector.shape_cast %8 : vector<1x16x384xbf16> to vector<16x384xbf16>
    %10 = tpu.concatenate %7, %9 in 1 : vector<16x384xbf16>, vector<16x384xbf16> -> vector<16x768xbf16>
    %11 = vector.extract_strided_slice %0 {offsets = [0, 0, 2], sizes = [1, 16, 384], strides = [1, 1, 1]} : vector<2x16x456xbf16> to vector<1x16x384xbf16>
    %12 = vector.shape_cast %11 : vector<1x16x384xbf16> to vector<16x384xbf16>
    %13 = vector.extract_strided_slice %0 {offsets = [1, 0, 2], sizes = [1, 16, 384], strides = [1, 1, 1]} : vector<2x16x456xbf16> to vector<1x16x384xbf16>
    %14 = vector.shape_cast %13 : vector<1x16x384xbf16> to vector<16x384xbf16>
    %15 = tpu.concatenate %12, %14 in 1 : vector<16x384xbf16>, vector<16x384xbf16> -> vector<16x768xbf16>
    %16 = vector.extract_strided_slice %0 {offsets = [0, 0, 24], sizes = [1, 16, 384], strides = [1, 1, 1]} : vector<2x16x456xbf16> to vector<1x16x384xbf16>
    %17 = vector.shape_cast %16 : vector<1x16x384xbf16> to vector<16x384xbf16>
    %18 = vector.extract_strided_slice %0 {offsets = [1, 0, 24], sizes = [1, 16, 384], strides = [1, 1, 1]} : vector<2x16x456xbf16> to vector<1x16x384xbf16>
    %19 = vector.shape_cast %18 : vector<1x16x384xbf16> to vector<16x384xbf16>
    %20 = tpu.concatenate %17, %19 in 1 : vector<16x384xbf16>, vector<16x384xbf16> -> vector<16x768xbf16>
    %21 = vector.extract_strided_slice %0 {offsets = [0, 0, 25], sizes = [1, 16, 384], strides = [1, 1, 1]} : vector<2x16x456xbf16> to vector<1x16x384xbf16>
    %22 = vector.shape_cast %21 : vector<1x16x384xbf16> to vector<16x384xbf16>
    %23 = vector.extract_strided_slice %0 {offsets = [1, 0, 25], sizes = [1, 16, 384], strides = [1, 1, 1]} : vector<2x16x456xbf16> to vector<1x16x384xbf16>
    %24 = vector.shape_cast %23 : vector<1x16x384xbf16> to vector<16x384xbf16>
    %25 = tpu.concatenate %22, %24 in 1 : vector<16x384xbf16>, vector<16x384xbf16> -> vector<16x768xbf16>
    %26 = vector.extract_strided_slice %0 {offsets = [0, 0, 26], sizes = [1, 16, 384], strides = [1, 1, 1]} : vector<2x16x456xbf16> to vector<1x16x384xbf16>
    %27 = vector.shape_cast %26 : vector<1x16x384xbf16> to vector<16x384xbf16>
    %28 = vector.extract_strided_slice %0 {offsets = [1, 0, 26], sizes = [1, 16, 384], strides = [1, 1, 1]} : vector<2x16x456xbf16> to vector<1x16x384xbf16>
    %29 = vector.shape_cast %28 : vector<1x16x384xbf16> to vector<16x384xbf16>
    %30 = tpu.concatenate %27, %29 in 1 : vector<16x384xbf16>, vector<16x384xbf16> -> vector<16x768xbf16>
    %31 = vector.extract_strided_slice %0 {offsets = [0, 0, 48], sizes = [1, 16, 384], strides = [1, 1, 1]} : vector<2x16x456xbf16> to vector<1x16x384xbf16>
    %32 = vector.shape_cast %31 : vector<1x16x384xbf16> to vector<16x384xbf16>
    %33 = vector.extract_strided_slice %0 {offsets = [1, 0, 48], sizes = [1, 16, 384], strides = [1, 1, 1]} : vector<2x16x456xbf16> to vector<1x16x384xbf16>
    %34 = vector.shape_cast %33 : vector<1x16x384xbf16> to vector<16x384xbf16>
    %35 = tpu.concatenate %32, %34 in 1 : vector<16x384xbf16>, vector<16x384xbf16> -> vector<16x768xbf16>
    %36 = vector.extract_strided_slice %0 {offsets = [0, 0, 49], sizes = [1, 16, 384], strides = [1, 1, 1]} : vector<2x16x456xbf16> to vector<1x16x384xbf16>
    %37 = vector.shape_cast %36 : vector<1x16x384xbf16> to vector<16x384xbf16>
    %38 = vector.extract_strided_slice %0 {offsets = [1, 0, 49], sizes = [1, 16, 384], strides = [1, 1, 1]} : vector<2x16x456xbf16> to vector<1x16x384xbf16>
    %39 = vector.shape_cast %38 : vector<1x16x384xbf16> to vector<16x384xbf16>
    %40 = tpu.concatenate %37, %39 in 1 : vector<16x384xbf16>, vector<16x384xbf16> -> vector<16x768xbf16>
    %41 = vector.extract_strided_slice %0 {offsets = [0, 0, 50], sizes = [1, 16, 384], strides = [1, 1, 1]} : vector<2x16x456xbf16> to vector<1x16x384xbf16>
    %42 = vector.shape_cast %41 : vector<1x16x384xbf16> to vector<16x384xbf16>
    %43 = vector.extract_strided_slice %0 {offsets = [1, 0, 50], sizes = [1, 16, 384], strides = [1, 1, 1]} : vector<2x16x456xbf16> to vector<1x16x384xbf16>
    %44 = vector.shape_cast %43 : vector<1x16x384xbf16> to vector<16x384xbf16>
    %45 = tpu.concatenate %42, %44 in 1 : vector<16x384xbf16>, vector<16x384xbf16> -> vector<16x768xbf16>
    %46 = tpu.concatenate %5, %10, %15, %20, %25, %30, %35, %40, %45 in 0 : vector<16x768xbf16>, vector<16x768xbf16>, vector<16x768xbf16>, vector<16x768xbf16>, vector<16x768xbf16>, vector<16x768xbf16>, vector<16x768xbf16>, vector<16x768xbf16>, vector<16x768xbf16> -> vector<144x768xbf16>
    %c0_2 = arith.constant 0 : index
    %c0_3 = arith.constant 0 : index
    %47 = vector.load %arg2[%c0_2, %c0_3] : memref<16x144xbf16, #tpu.memory_space<vmem>>, vector<16x144xbf16>
    %cst = arith.constant dense<0.000000e+00> : vector<16x768xf32>
    %48 = tpu.matmul %47, %46, %cst {dimension_numbers = #tpu.dot_dimension_numbers<[1], [0], [0], [1], [0, 0, 1, 1], [], []>} : vector<16x144xbf16>, vector<144x768xbf16>, vector<16x768xf32> -> vector<16x768xf32>
    %c0_4 = arith.constant 0 : index
    %c0_5 = arith.constant 0 : index
    %49 = vector.load %arg3[%c0_4, %c0_5] : memref<16x1xf32, #tpu.memory_space<vmem>>, vector<16x1xf32>
    %50 = vector.broadcast %49 : vector<16x1xf32> to vector<16x768xf32>
    %51 = arith.addf %48, %50 : vector<16x768xf32>
    %52 = vector.extract_strided_slice %51 {offsets = [0, 0], sizes = [8, 768], strides = [1, 1]} : vector<16x768xf32> to vector<8x768xf32>
    %53 = vector.extract_strided_slice %51 {offsets = [8, 0], sizes = [8, 768], strides = [1, 1]} : vector<16x768xf32> to vector<8x768xf32>
    %54 = arith.maximumf %52, %53 : vector<8x768xf32>
    %55 = arith.truncf %54 : vector<8x768xf32> to vector<8x768xbf16>
    %56 = vector.extract_strided_slice %55 {offsets = [0, 0], sizes = [8, 384], strides = [1, 1]} : vector<8x768xbf16> to vector<8x384xbf16>
    %c0_6 = arith.constant 0 : index
    %c0_7 = arith.constant 0 : index
    %c0_8 = arith.constant 0 : index
    %57 = vector.load %arg4[%c0_6, %c0_7, %c0_8] : memref<2x8x384xbf16, #tpu.memory_space<vmem>>, vector<1x8x384xbf16>
    %58 = vector.shape_cast %57 : vector<1x8x384xbf16> to vector<8x384xbf16>
    %59 = vector.shape_cast %56 : vector<8x384xbf16> to vector<1x8x384xbf16>
    tpu.vector_store %arg4[%c0_6, %c0_7, %c0_8], %59 {strides = array<i32>} : memref<2x8x384xbf16, #tpu.memory_space<vmem>>, vector<1x8x384xbf16>,
    %60 = vector.extract_strided_slice %55 {offsets = [0, 384], sizes = [8, 384], strides = [1, 1]} : vector<8x768xbf16> to vector<8x384xbf16>
    %c1 = arith.constant 1 : index
    %c0_9 = arith.constant 0 : index
    %c0_10 = arith.constant 0 : index
    %61 = vector.load %arg4[%c1, %c0_9, %c0_10] : memref<2x8x384xbf16, #tpu.memory_space<vmem>>, vector<1x8x384xbf16>
    %62 = vector.shape_cast %61 : vector<1x8x384xbf16> to vector<8x384xbf16>
    %63 = vector.shape_cast %60 : vector<8x384xbf16> to vector<1x8x384xbf16>
    tpu.vector_store %arg4[%c1, %c0_9, %c0_10], %63 {strides = array<i32>} : memref<2x8x384xbf16, #tpu.memory_space<vmem>>, vector<1x8x384xbf16>,
    return
  }
  func.func @transform_0(%arg0: i32) -> (i32, i32, i32) {
    %c0_i32 = arith.constant 0 : i32
    %c0_i32_0 = arith.constant 0 : i32
    %c0_i32_1 = arith.constant 0 : i32
    return %arg0, %c0_i32, %c0_i32_0 : i32, i32, i32
  }
  func.func @transform_1(%arg0: i32) -> (i32, i32) {
    %c0_i32 = arith.constant 0 : i32
    %c0_i32_0 = arith.constant 0 : i32
    %c0_i32_1 = arith.constant 0 : i32
    return %c0_i32, %c0_i32_0 : i32, i32
  }
  func.func @transform_2(%arg0: i32) -> (i32, i32) {
    %c0_i32 = arith.constant 0 : i32
    %c0_i32_0 = arith.constant 0 : i32
    %c0_i32_1 = arith.constant 0 : i32
    return %c0_i32, %c0_i32_0 : i32, i32
  }
  func.func @transform_3(%arg0: i32) -> (i32, i32, i32) {
    %c0_i32 = arith.constant 0 : i32
    %c0_i32_0 = arith.constant 0 : i32
    %c0_i32_1 = arith.constant 0 : i32
    return %arg0, %c0_i32, %c0_i32_0 : i32, i32, i32
  }
}

</mosaic_0001>

<bundles_post_ra>
// kernel: mfm_forward.1
= control target key start
LH: loop header
LB: loop body
LE: loop exit
PB: predicated region body
PF: predicated region fallthrough
CT: control target
= control target key end

     0   :  { %s584_s20 = smov 80   ;;  %s585_s21 = smov 79   ;;  %vm272_vm0 = vcmask 637952   ;;  %vm243_vm1 = vcmask 646144   ;;  %vm214_vm2 = vcmask 654336   ;;  %vm185_vm3 = vcmask 834560   ;;  %s952_s0 = inlined_call_operand.vmem [shape: bf16[2,16,456], index: 0, kind: input, shape index: {}]   ;;  %s953_s1 = inlined_call_operand.vmem [shape: bf16[16,144], index: 1, kind: input, shape index: {}]   ;;  %s954_s2 = inlined_call_operand.vmem [shape: f32[16,1], index: 2, kind: input, shape index: {}]   ;;  %s955_s3 = inlined_call_operand.vmem [shape: bf16[2,8,384], index: 3, kind: output, shape index: {}]  }
   0x1   :  { %v524_v0 = vld [vmem:[%s952_s0 + $0x8] sm:$0xf]  ;;  %v565_v1 = vld [vmem:[%s952_s0 + $0x14] sm:$0xf0]  ;;  %v562_v2 = vld [vmem:[%s952_s0 + $0x4] sm:$0xf] }
   0x2   :  { %v622_v3 = vor.u32 %v565_v1, %v524_v0  ;;  %v518_v4 = vld [vmem:[%s952_s0 + $0x10] sm:$0xf0]  ;;  %s586_s22 = smov 78   ;;  %v563_v6 = vld [vmem:[%s952_s0 + $0xc] sm:$0xf]  ;;  %s587_s27 = smov 102  }
   0x3   :  { %v627_v5 = vor.u32 %v562_v2, %v518_v4  ;;  %v538_v7 = vld [vmem:[%s952_s0 + $0x18] sm:$0xf0]  ;;  %v566_v9 = vld [vmem:[%s952_s0 + $0x24] sm:$0xf]  ;;  %v530_v10 = vld [vmem:[%s952_s0 + $0x30] sm:$0xf0] }
   0x4   :  { %210 = vrot.lane.b32.xlu1 %v622_v3, %s584_s20  ;;  %239 = vrot.lane.b32.xlu0 %v622_v3, %s585_s21  ;;  %v541_v8 = vor.u32 %v563_v6, %v538_v7  ;;  %v528_v11 = vld [vmem:[%s952_s0 + $0x20] sm:$0xf]  ;;  %v568_v12 = vld [vmem:[%s952_s0 + $0x2c] sm:$0xf0]  ;;  %v662_v13 = vor.u32 %v566_v9, %v530_v10  ;;  %s588_s9 = smov 103   ;;  %s589_s14 = smov 104  }
   0x5   :  { %266 = vrot.lane.b32.xlu2 %v627_v5, %s586_s22  ;;  %v664_v14 = vor.u32 %v568_v12, %v528_v11  ;;  %v516_v15 = vld [vmem:[%s952_s0] sm:$0xf]  ;;  %v564_v16 = vld [vmem:[%s952_s0 + $0xc] sm:$0xf0]  ;;  %s590_s15 = smov 126   ;;  %s591_s16 = smov 127  }
   0x6   :  { %v678_v17 = vor.u32 %v564_v16, %v516_v15  ;;  %v536_v18 = vld [vmem:[%s952_s0 + $0x28] sm:$0xf]  ;;  %v569_v19 = vld [vmem:[%s952_s0 + $0x34] sm:$0xf0]  ;;  %v567_v24 = vld [vmem:[%s952_s0 + $0x2c] sm:$0xf] }
   0x7   :  { %v723_v20 = vor.u32 %v569_v19, %v536_v18  ;;  %v542_v25 = vld [vmem:[%s952_s0 + $0x38] sm:$0xf0]  ;;  %vm156_vm4 = vcmask 842752   ;;  %vm127_vm5 = vcmask 850944   ;;  %v570_v61 = vld [vmem:[%s953_s1 + $0x4] sm:$0xf] }
   0x8   :  { %v753_v27 = vor.u32 %v567_v24, %v542_v25  ;;  %v550_v62 = vld [vmem:[%s953_s1 + $0x8] sm:$0xf0]  ;;  %vm316_vm6 = vcmask 130048   ;;  %vm98_vm7 = vcmask 1031168   ;;  %vm66_vm8 = vcmask 1039360  }
   0x9   :  { %v825_v0 = vor.u32 %v570_v61, %v550_v62  ;;  %v548_v24 = vld [vmem:[%s953_s1] sm:$0xf]  ;;  %v571_v25 = vld [vmem:[%s953_s1 + $0x4] sm:$0xf0]  ;;  %vm503_vm9 = vcmask 1043456  }
   0xa   :  { %v296_v61 = vld [vmem:[%s954_s2 + $0x8] sm:$0xff] }
   0xc   :  { %212 = vrot.lane.b32.xlu1 %v541_v8, %s584_s20  ;;  %241 = vrot.lane.b32.xlu0 %v541_v8, %s585_s21 }
   0xd   :  { %268 = vrot.lane.b32.xlu2 %v622_v3, %s586_s22 }
  0x14   :  { %183 = vrot.lane.b32.xlu1 %v541_v8, %s587_s27  ;;  %181 = vrot.lane.b32.xlu0 %v622_v3, %s587_s27 }
  0x15   :  { %237 = vrot.lane.b32.xlu2 %v627_v5, %s585_s21 }
  0x1c   :  { %252 = vrot.lane.b32.xlu1 %v662_v13, %s585_s21  ;;  %250 = vrot.lane.b32.xlu0 %v664_v14, %s585_s21 }
  0x1d   :  { %152 = vrot.lane.b32.xlu2 %v622_v3, %s588_s9 }
  0x24   :  { %154 = vrot.lane.b32.xlu0 %v541_v8, %s588_s9  ;;  %208 = vrot.lane.b32.xlu1 %v627_v5, %s584_s20 }
  0x25   :  { %264 = vrot.lane.b32.xlu2 %v678_v17, %s586_s22 }
  0x2c   :  { %221 = vrot.lane.b32.xlu0 %v664_v14, %s584_s20  ;;  %223 = vrot.lane.b32.xlu1 %v662_v13, %s584_s20 }
  0x2d   :  { %235 = vrot.lane.b32.xlu2 %v678_v17, %s585_s21 }
  0x34   :  { %123 = vrot.lane.b32.xlu0 %v622_v3, %s589_s14  ;;  %125 = vrot.lane.b32.xlu1 %v541_v8, %s589_s14 }
  0x35   :  { %179 = vrot.lane.b32.xlu2 %v627_v5, %s587_s27 }
  0x3c   :  { %192 = vrot.lane.b32.xlu0 %v664_v14, %s587_s27  ;;  %194 = vrot.lane.b32.xlu1 %v662_v13, %s587_s27 }
  0x3d   :  { %206 = vrot.lane.b32.xlu2 %v678_v17, %s584_s20 }
  0x44   :  { %94 = vrot.lane.b32.xlu0 %v622_v3, %s590_s15  ;;  %96 = vrot.lane.b32.xlu1 %v541_v8, %s590_s15 }
  0x45   :  { %150 = vrot.lane.b32.xlu2 %v627_v5, %s588_s9 }
  0x4c   :  { %163 = vrot.lane.b32.xlu0 %v664_v14, %s588_s9  ;;  %165 = vrot.lane.b32.xlu1 %v662_v13, %s588_s9 }
  0x4d   :  { %177 = vrot.lane.b32.xlu2 %v678_v17, %s587_s27 }
  0x54   :  { %270 = vrot.lane.b32.xlu0 %v541_v8, %s586_s22  ;;  %62 = vrot.lane.b32.xlu1 %v622_v3, %s591_s16 }
  0x55   :  { %64 = vrot.lane.b32.xlu2 %v541_v8, %s591_s16 }
  0x5c   :  { %121 = vrot.lane.b32.xlu0 %v627_v5, %s589_s14  ;;  %254 = vrot.lane.b32.xlu1 %v723_v20, %s585_s21 }
  0x5d   :  { %134 = vrot.lane.b32.xlu2 %v664_v14, %s589_s14 }
  0x5f   :  { %v267_v21 = vpop.permute.xlu2 %266 }
  0x64   :  { %136 = vrot.lane.b32.xlu0 %v662_v13, %s589_s14  ;;  %148 = vrot.lane.b32.xlu1 %v678_v17, %s588_s9 }
  0x65   :  { %92 = vrot.lane.b32.xlu2 %v627_v5, %s590_s15 }
  0x67   :  { %v737_v22 = vpop.permute.xlu2 %268 }
  0x68   :  { %v274_v23 = vsel %vm272_vm0, %v267_v21, %v737_v22 }
  0x69   :  { %369 = vmatpush.bf16.msra.mxu3 %v274_v23 }
  0x6c   :  { %225 = vrot.lane.b32.xlu0 %v723_v20, %s584_s20  ;;  %105 = vrot.lane.b32.xlu1 %v664_v14, %s590_s15 }
  0x6d   :  { %107 = vrot.lane.b32.xlu2 %v662_v13, %s590_s15  ;;  %555 = vmatmul.msk.bf16.vlgmr.msra.gmra.mxu3 %vm316_vm6, %v825_v0 }
  0x6f   :  { %v238_v26 = vpop.permute.xlu2 %237 }
  0x74   :  { %119 = vrot.lane.b32.xlu0 %v678_v17, %s589_s14  ;;  %256 = vrot.lane.b32.xlu1 %v753_v27, %s585_s21 }
  0x75   :  { %60 = vrot.lane.b32.xlu2 %v627_v5, %s591_s16 }
  0x76   :  { %v211_v28 = vpop.permute.xlu1 %210  ;;  %v240_v29 = vpop.permute.xlu0 %239 }
  0x77   :  { %v153_v30 = vpop.permute.xlu2 %152  ;;  %v245_v31 = vsel %vm243_vm1, %v238_v26, %v240_v29 }
  0x78   :  { %348 = vmatpush.bf16.msra.mxu2 %v245_v31 }
  0x7c   :  { %196 = vrot.lane.b32.xlu0 %v723_v20, %s587_s27  ;;  %76 = vrot.lane.b32.xlu1 %v664_v14, %s591_s16 }
  0x7d   :  { %78 = vrot.lane.b32.xlu2 %v662_v13, %s591_s16 }
  0x7e   :  { %v213_v32 = vpop.permute.xlu1 %212  ;;  %v242_v33 = vpop.permute.xlu0 %241 }
  0x7f   :  { %v265_v34 = vpop.permute.xlu2 %264  ;;  %v246_v35 = vsel %vm243_vm1, %v240_v29, %v242_v33  ;;  %v217_v37 = vsel %vm214_vm2, %v211_v28, %v213_v32 }
  0x80   :  { %v273_v36 = vsel %vm272_vm0, %v265_v34, %v267_v21 }
  0x81   :  { %341 = vmatpush.bf16.msra.mxu1 %v273_v36 }
  0x84   :  { %90 = vrot.lane.b32.xlu0 %v678_v17, %s590_s15  ;;  %227 = vrot.lane.b32.xlu1 %v753_v27, %s584_s20 }
  0x85   :  { %376 = vmatpush.bf16.msrb.mxu1 %v246_v35  ;;  %167 = vrot.lane.b32.xlu2 %v723_v20, %s588_s9 }
  0x86   :  { %v184_v38 = vpop.permute.xlu1 %183  ;;  %v182_v39 = vpop.permute.xlu0 %181  ;;  %554 = vmatmul.msk.bf16.vlgmr.msra.gmra.mxu1 %vm316_vm6, %v825_v0 }
  0x87   :  { %v236_v40 = vpop.permute.xlu2 %235  ;;  %v188_v41 = vsel %vm185_vm3, %v182_v39, %v184_v38 }
  0x88   :  { %v244_v42 = vsel %vm243_vm1, %v236_v40, %v238_v26  ;;  %v859_v26 = vor.u32 %v571_v25, %v548_v24 }
  0x89   :  { %377 = vmatpush.bf16.msrb.mxu1 %v217_v37  ;;  %320 = vmatpush.bf16.msra.mxu0 %v244_v42 }
  0x8c   :  { %58 = vrot.lane.b32.xlu0 %v678_v17, %s591_s16  ;;  %198 = vrot.lane.b32.xlu1 %v753_v27, %s587_s27 }
  0x8d   :  { %378 = vmatpush.bf16.msrb.mxu1 %v188_v41  ;;  %138 = vrot.lane.b32.xlu2 %v723_v20, %s589_s14 }
  0x8e   :  { %v785_v43 = vpop.permute.xlu1 %252  ;;  %v787_v44 = vpop.permute.xlu0 %250 }
  0x8f   :  { %v180_v45 = vpop.permute.xlu2 %179  ;;  %v258_v23 = vsel %vm243_vm1, %v787_v44, %v785_v43 }
  0x90   :  { %v187_v52 = vsel %vm185_vm3, %v180_v45, %v182_v39 }
  0x94   :  { %169 = vrot.lane.b32.xlu0 %v753_v27, %s588_s9  ;;  %109 = vrot.lane.b32.xlu1 %v723_v20, %s590_s15 }
  0x95   :  { %281 = vrot.lane.b32.xlu2 %v662_v13, %s586_s22 }
  0x96   :  { %v155_v46 = vpop.permute.xlu0 %154  ;;  %v209_v47 = vpop.permute.xlu1 %208 }
  0x97   :  { %v207_v48 = vpop.permute.xlu2 %206  ;;  %v216_v49 = vsel %vm214_vm2, %v209_v47, %v211_v28  ;;  %v159_v50 = vsel %vm156_vm4, %v153_v30, %v155_v46  ;;  %v592_v46 = vmov 0  }
  0x98   :  { %349 = vmatpush.bf16.msra.mxu2 %v216_v49  ;;  %379 = vmatpush.bf16.msrb.mxu1 %v159_v50  ;;  %v215_v51 = vsel %vm214_vm2, %v207_v48, %v209_v47 }
  0x99   :  { %321 = vmatpush.bf16.msra.mxu0 %v215_v51  ;;  %581 = vset.pattern.permute.xlu1 %v592_v46 }
  0x9a   :  { %582 = vset.pattern.permute.xlu2 %v592_v46  ;;  %583 = vset.pattern.permute.xlu0 %v592_v46 }
  0x9c   :  { %283 = vrot.lane.b32.xlu0 %v723_v20, %s586_s22  ;;  %140 = vrot.lane.b32.xlu1 %v753_v27, %s589_s14 }
  0x9d   :  { %80 = vrot.lane.b32.xlu2 %v723_v20, %s591_s16  ;;  %350 = vmatpush.bf16.msra.mxu2 %v187_v52 }
  0x9e   :  { %v222_v53 = vpop.permute.xlu0 %221  ;;  %v805_v54 = vpop.permute.xlu1 %223 }
  0x9f   :  { %v807_v55 = vpop.permute.xlu2 %150 }
  0xa0   :  { %v158_v56 = vsel %vm156_vm4, %v807_v55, %v153_v30 }
  0xa1   :  { %351 = vmatpush.bf16.msra.mxu2 %v158_v56 }
  0xa4   :  { %111 = vrot.lane.b32.xlu0 %v753_v27, %s590_s15  ;;  %82 = vrot.lane.b32.xlu1 %v753_v27, %s591_s16 }
  0xa5   :  { %279 = vrot.lane.b32.xlu2 %v664_v14, %s586_s22 }
  0xa6   :  { %v124_v57 = vpop.permute.xlu0 %123  ;;  %v126_v58 = vpop.permute.xlu1 %125 }
  0xa7   :  { %v178_v59 = vpop.permute.xlu2 %177  ;;  %v130_v60 = vsel %vm127_vm5, %v124_v57, %v126_v58 }
  0xa8   :  { %380 = vmatpush.bf16.msrb.mxu1 %v130_v60  ;;  %v186_v63 = vsel %vm185_vm3, %v178_v59, %v180_v45 }
  0xa9   :  { %322 = vmatpush.bf16.msra.mxu0 %v186_v63 }
  0xac   :  { %285 = vrot.lane.b32.xlu0 %v753_v27, %s586_s22 }
  0xad   :  { %304 = vperm.xlu2 %582, %v296_v61  }
  0xae   :  { %v193_v1 = vpop.permute.xlu0 %192  ;;  %v833_v2 = vpop.permute.xlu1 %194 }
  0xaf   :  { %v65_v4 = vpop.permute.xlu2 %64  ;;  %v200_v31 = vsel %vm185_vm3, %v193_v1, %v833_v2 }
  0xb6   :  { %v95_v6 = vpop.permute.xlu0 %94  ;;  %v97_v7 = vpop.permute.xlu1 %96 }
  0xb7   :  { %v135_v8 = vpop.permute.xlu2 %134  ;;  %v101_v9 = vsel %vm98_vm7, %v95_v6, %v97_v7 }
  0xb8   :  { %381 = vmatpush.bf16.msrb.mxu1 %v101_v9 }
  0xbe   :  { %v164_v10 = vpop.permute.xlu0 %163  ;;  %v836_v11 = vpop.permute.xlu1 %165 }
  0xbf   :  { %v838_v12 = vpop.permute.xlu2 %92  ;;  %v171_v32 = vsel %vm156_vm4, %v164_v10, %v836_v11 }
  0xc6   :  { %v271_v15 = vpop.permute.xlu0 %270  ;;  %v63_v16 = vpop.permute.xlu1 %62 }
  0xc7   :  { %v840_v18 = vpop.permute.xlu2 %107  ;;  %v275_v19 = vsel %vm272_vm0, %v737_v22, %v271_v15  ;;  %v69_v21 = vsel %vm66_vm8, %v63_v16, %v65_v4  ;;  %v229_v22 = vsel %vm214_vm2, %v222_v53, %v805_v54 }
  0xc8   :  { %397 = vmatpush.bf16.msrb.mxu3 %v275_v19  ;;  %382 = vmatpush.bf16.msrb.mxu1 %v69_v21 }
  0xcb   :  { %556 = vmatmul.msk.bf16.vlgmr.msrb.gmra.mxu3 %vm316_vm6, %v825_v0 }
  0xcc   :  { %404 = vmatpush.bf16.msra.mxu3 %v258_v23  ;;  %383 = vmatpush.bf16.msrb.mxu1 %v622_v3  ;;  %v100_v3 = vsel %vm98_vm7, %v838_v12, %v95_v6 }
  0xce   :  { %v122_v27 = vpop.permute.xlu0 %121  ;;  %v861_v28 = vpop.permute.xlu1 %254 }
  0xcf   :  { %v863_v29 = vpop.permute.xlu2 %60  ;;  %v129_v30 = vsel %vm127_vm5, %v122_v27, %v124_v57  ;;  %384 = vmatmul.bf16.vlgmr.msrb.gmra.mxu1 %v859_v26  ;;  %v259_v39 = vsel %vm243_vm1, %v785_v43, %v861_v28 }
  0xd0   :  { %405 = vmatpush.bf16.msra.mxu3 %v229_v22  ;;  %352 = vmatpush.bf16.msra.mxu2 %v129_v30  ;;  %v68_v37 = vsel %vm66_vm8, %v863_v29, %v63_v16 }
  0xd4   :  { %406 = vmatpush.bf16.msra.mxu3 %v200_v31  ;;  %353 = vmatpush.bf16.msra.mxu2 %v100_v3 }
  0xd6   :  { %v137_v33 = vpop.permute.xlu0 %136  ;;  %v149_v34 = vpop.permute.xlu1 %148 }
  0xd7   :  { %v873_v35 = vpop.permute.xlu2 %78  ;;  %v157_v36 = vsel %vm156_vm4, %v149_v34, %v807_v55  ;;  %v142_v38 = vsel %vm127_vm5, %v135_v8, %v137_v33 }
  0xd8   :  { %407 = vmatpush.bf16.msra.mxu3 %v171_v32  ;;  %323 = vmatpush.bf16.msra.mxu0 %v157_v36 }
  0xd9   :  { %354 = vmatpush.bf16.msra.mxu2 %v68_v37 }
  0xdc   :  { %408 = vmatpush.bf16.msra.mxu3 %v142_v38 }
  0xdd   :  { %355 = vmatpush.bf16.msra.mxu2 %v627_v5  ;;  %v295_v5 = vld [vmem:[%s954_s2] sm:$0xff] }
  0xde   :  { %v226_v40 = vpop.permute.xlu0 %225  ;;  %v106_v41 = vpop.permute.xlu1 %105  ;;  %299 = vperm.xlu1 %581, %v295_v5  }
  0xdf   :  { %v884_v42 = vpop.permute.xlu2 %167  ;;  %v230_v44 = vsel %vm214_vm2, %v805_v54, %v226_v40  ;;  %v113_v45 = vsel %vm98_vm7, %v106_v41, %v840_v18 }
  0xe0   :  { %356 = vmatmul.bf16.vlgmr.msra.gmra.mxu2 %v859_v26  ;;  %409 = vmatpush.bf16.msra.mxu3 %v113_v45  ;;  %v172_v55 = vsel %vm156_vm4, %v836_v11, %v884_v42 }
  0xe1   :  { %432 = vmatpush.bf16.msrb.mxu2 %v259_v39 }
  0xe5   :  { %433 = vmatpush.bf16.msrb.mxu2 %v230_v44 }
  0xe6   :  { %v120_v43 = vpop.permute.xlu0 %119  ;;  %v257_v47 = vpop.permute.xlu1 %256 }
  0xe7   :  { %v139_v48 = vpop.permute.xlu2 %138  ;;  %v128_v49 = vsel %vm127_vm5, %v120_v43, %v122_v27  ;;  %v260_v4 = vsel %vm243_vm1, %v861_v28, %v257_v47 }
  0xe8   :  { %324 = vmatpush.bf16.msra.mxu0 %v128_v49  ;;  %v143_v60 = vsel %vm127_vm5, %v137_v33, %v139_v48 }
  0xee   :  { %v197_v50 = vpop.permute.xlu0 %196  ;;  %v77_v51 = vpop.permute.xlu1 %76 }
  0xef   :  { %v282_v52 = vpop.permute.xlu2 %281  ;;  %v84_v53 = vsel %vm66_vm8, %v77_v51, %v873_v35  ;;  %v201_v54 = vsel %vm185_vm3, %v833_v2, %v197_v50 }
  0xf0   :  { %410 = vmatpush.bf16.msra.mxu3 %v84_v53  ;;  %434 = vmatpush.bf16.msrb.mxu2 %v201_v54  ;;  %v371_v22 = vpop.f32.mrf.mxu3 }
  0xf4   :  { %411 = vmatpush.bf16.msra.mxu3 %v664_v14  ;;  %435 = vmatpush.bf16.msrb.mxu2 %v172_v55 }
  0xf6   :  { %v91_v56 = vpop.permute.xlu0 %90  ;;  %v228_v57 = vpop.permute.xlu1 %227 }
  0xf7   :  { %v81_v58 = vpop.permute.xlu2 %80  ;;  %412 = vmatmul.bf16.vlgmr.msra.gmra.mxu3 %v859_v26  ;;  %v99_v59 = vsel %vm98_vm7, %v91_v56, %v838_v12  ;;  %v231_v9 = vsel %vm214_vm2, %v226_v40, %v228_v57 }
  0xf8   :  { %325 = vmatpush.bf16.msra.mxu0 %v99_v59  ;;  %436 = vmatpush.bf16.msrb.mxu2 %v143_v60  ;;  %v373_v27 = vpop.f32.mrf.mxu3 }
  0xfe   :  { %v59_v62 = vpop.permute.xlu0 %58  ;;  %v199_v14 = vpop.permute.xlu1 %198 }
  0xff   :  { %v67_v63 = vsel %vm66_vm8, %v59_v62, %v863_v29  ;;  %v280_v1 = vpop.permute.xlu2 %279  ;;  %v202_v10 = vsel %vm185_vm3, %v197_v50, %v199_v14 }
 0x100   :  { %326 = vmatpush.bf16.msra.mxu0 %v67_v63  ;;  %v287_v2 = vsel %vm272_vm0, %v280_v1, %v282_v52 }
 0x101   :  { %425 = vmatpush.bf16.msrb.mxu3 %v287_v2 }
 0x103   :  { %v343_v29 = vpop.f32.mrf.mxu1 }
 0x104   :  { %327 = vmatpush.bf16.msra.mxu0 %v678_v17  ;;  %v85_v17 = vsel %vm66_vm8, %v873_v35, %v81_v58 }
 0x106   :  { %v170_v6 = vpop.permute.xlu0 %169  ;;  %v110_v7 = vpop.permute.xlu1 %109 }
 0x107   :  { %328 = vmatmul.bf16.vlgmr.msra.gmra.mxu0 %v859_v26  ;;  %557 = vmatmul.msk.bf16.vlgmr.msrb.gmra.mxu3 %vm316_vm6, %v825_v0  ;;  %v114_v8 = vsel %vm98_vm7, %v840_v18, %v110_v7  ;;  %v173_v16 = vsel %vm156_vm4, %v884_v42, %v170_v6  ;;  %v305_v38 = vpop.permute.xlu2 %304 }
 0x108   :  { %460 = vmatpush.bf16.msrb.mxu0 %v260_v4  ;;  %437 = vmatpush.bf16.msrb.mxu2 %v114_v8 }
 0x10b   :  { %v345_v31 = vpop.f32.mrf.mxu1 }
 0x10c   :  { %461 = vmatpush.bf16.msrb.mxu0 %v231_v9  ;;  %438 = vmatpush.bf16.msrb.mxu2 %v85_v17 }
 0x10e   :  { %v284_v11 = vpop.permute.xlu0 %283  ;;  %v141_v15 = vpop.permute.xlu1 %140 }
 0x10f   :  { %v288_v12 = vsel %vm272_vm0, %v282_v52, %v284_v11  ;;  %v144_v18 = vsel %vm127_vm5, %v139_v48, %v141_v15 }
 0x110   :  { %462 = vmatpush.bf16.msrb.mxu0 %v202_v10  ;;  %439 = vmatpush.bf16.msrb.mxu2 %v662_v13 }
 0x111   :  { %453 = vmatpush.bf16.msra.mxu1 %v288_v12 }
 0x113   :  { %440 = vmatmul.bf16.vlgmr.msrb.gmra.mxu2 %v859_v26 }
 0x114   :  { %463 = vmatpush.bf16.msrb.mxu0 %v173_v16  ;;  %558 = vmatmul.msk.bf16.vlgmr.msra.gmra.mxu1 %vm316_vm6, %v825_v0 }
 0x116   :  { %v112_v19 = vpop.permute.xlu0 %111  ;;  %v83_v23 = vpop.permute.xlu1 %82 }
 0x117   :  { %v115_v21 = vsel %vm98_vm7, %v110_v7, %v112_v19  ;;  %v86_v13 = vsel %vm66_vm8, %v81_v58, %v83_v23 }
 0x118   :  { %464 = vmatpush.bf16.msrb.mxu0 %v144_v18 }
 0x11c   :  { %465 = vmatpush.bf16.msrb.mxu0 %v115_v21 }
 0x11e   :  { %v286_v24 = vpop.permute.xlu0 %285 }
 0x11f   :  { %v289_v25 = vsel %vm272_vm0, %v284_v11, %v286_v24 }
 0x120   :  { %466 = vmatpush.bf16.msrb.mxu0 %v86_v13  ;;  %481 = vmatpush.bf16.msrb.mxu1 %v289_v25 }
 0x124   :  { %467 = vmatpush.bf16.msrb.mxu0 %v723_v20  ;;  %559 = vmatmul.msk.bf16.vlgmr.msrb.gmra.mxu1 %vm316_vm6, %v825_v0 }
 0x127   :  { %468 = vmatmul.bf16.vlgmr.msrb.gmra.mxu0 %v859_v26 }
 0x14c   :  { %v385_v33 = vpop.f32.mrf.mxu1 }
 0x14e   :  { %v399_v28 = vpop.f32.mrf.mxu3 }
 0x150   :  { %v300_v36 = vpop.permute.xlu1 %299 }
 0x151   :  { %v386_v26 = vadd.f32 %v385_v33, %v300_v36 }
 0x153   :  { %v400_v50 = vadd.f32 %v399_v28, %v386_v26 }
 0x154   :  { %v387_v20 = vpop.f32.mrf.mxu1 }
 0x155   :  { %v388_v42 = vadd.f32 %v387_v20, %v305_v38 }
 0x156   :  { %v401_v30 = vpop.f32.mrf.mxu3 }
 0x157   :  { %v402_v53 = vadd.f32 %v401_v30, %v388_v42 }
 0x159   :  { %v490_v59 = vmax.f32 %v400_v50, %v402_v53 }
 0x163   :  { %v357_v32 = vpop.f32.mrf.mxu2 }
 0x164   :  { %v358_v39 = vadd.f32 %v357_v32, %v300_v36 }
 0x166   :  { %v372_v5 = vadd.f32 %v371_v22, %v358_v39 }
 0x16b   :  { %v359_v37 = vpop.f32.mrf.mxu2 }
 0x16c   :  { %v360_v40 = vadd.f32 %v359_v37, %v305_v38 }
 0x16e   :  { %v374_v43 = vadd.f32 %v373_v27, %v360_v40 }
 0x170   :  { %v489_v55 = vmax.f32 %v372_v5, %v374_v43 }
 0x17a   :  { %v413_v3 = vpop.f32.mrf.mxu3 }
 0x17b   :  { %v414_v45 = vadd.f32 %v413_v3, %v300_v36 }
 0x182   :  { %v415_v34 = vpop.f32.mrf.mxu3 }
 0x183   :  { %v416_v47 = vadd.f32 %v415_v34, %v305_v38 }
 0x184   :  { %v329_v35 = vpop.f32.mrf.mxu0 }
 0x185   :  { %v330_v41 = vadd.f32 %v329_v35, %v300_v36 }
 0x187   :  { %v344_v48 = vadd.f32 %v343_v29, %v330_v41 }
 0x18a   :  { %v427_v0 = vpop.f32.mrf.mxu3 }
 0x18b   :  { %v428_v52 = vadd.f32 %v427_v0, %v414_v45 }
 0x18c   :  { %v331_v44 = vpop.f32.mrf.mxu0 }
 0x18d   :  { %v332_v46 = vadd.f32 %v331_v44, %v305_v38 }
 0x18f   :  { %v346_v49 = vadd.f32 %v345_v31, %v332_v46 }
 0x191   :  { %v455_v51 = vpop.f32.mrf.mxu1  ;;  %v488_v54 = vmax.f32 %v344_v48, %v346_v49 }
 0x192   :  { %v429_v56 = vpop.f32.mrf.mxu3 }
 0x193   :  { %v494_v57 = vpack.c.bf16 %v489_v55, %v488_v54  ;;  %v430_v58 = vadd.f32 %v429_v56, %v416_v47 }
 0x195   :  { %497 = vst [vmem:[%s955_s3] sm:$0xff] %v494_v57  ;;  %v491_v60 = vmax.f32 %v428_v52, %v430_v58 }
 0x196   :  { %v441_v14 = vpop.f32.mrf.mxu2 }
 0x197   :  { %v495_v61 = vpack.c.bf16 %v491_v60, %v490_v59  ;;  %v442_v6 = vadd.f32 %v441_v14, %v300_v36 }
 0x199   :  { %v457_v62 = vpop.f32.mrf.mxu1  ;;  %498 = vst [vmem:[%s955_s3 + $0x8] sm:$0xf] %v495_v61  ;;  %v456_v11 = vadd.f32 %v455_v51, %v442_v6  ;;  %v501_v21 = vrot.slane %v495_v61, 4 }
 0x19e   :  { %v443_v2 = vpop.f32.mrf.mxu2 }
 0x19f   :  { %v444_v4 = vadd.f32 %v443_v2, %v305_v38 }
 0x1a1   :  { %v483_v1 = vpop.f32.mrf.mxu1  ;;  %v458_v9 = vadd.f32 %v457_v62, %v444_v4 }
 0x1a3   :  { %v492_v16 = vmax.f32 %v456_v11, %v458_v9 }
 0x1a4   :  { %v469_v63 = vpop.f32.mrf.mxu0 }
 0x1a5   :  { %v470_v7 = vadd.f32 %v469_v63, %v300_v36 }
 0x1a7   :  { %v484_v12 = vadd.f32 %v483_v1, %v470_v7 }
 0x1a9   :  { %v485_v10 = vpop.f32.mrf.mxu1 }
 0x1ac   :  { %v471_v8 = vpop.f32.mrf.mxu0 }
 0x1ad   :  { %v472_v17 = vadd.f32 %v471_v8, %v305_v38 }
 0x1af   :  { %v486_v15 = vadd.f32 %v485_v10, %v472_v17 }
 0x1b1   :  { %v493_v18 = vmax.f32 %v484_v12, %v486_v15 }
 0x1b3   :  { %v496_v19 = vpack.c.bf16 %v493_v18, %v492_v16 }
 0x1b5   :  { %v502_v23 = vrot.slane %v496_v19, 4 }
 0x1b7   :  { %v504_v13 = vsel %vm503_vm9, %v501_v21, %v502_v23  ;;  %561 = vst [vmem:[%s955_s3 + $0x14] sm:$0xf] %v502_v23 }
 0x1b8   :  { %560 = vst [vmem:[%s955_s3 + $0xc] sm:$0xff] %v504_v13 }

</bundles_post_ra>
